<compile_context>
chip_gen: v7x
topology: tpu7x:2x2x1
jax: 0.10.0
libtpu: 0.0.40
codegen_flags: <defaults>
</compile_context>

<pallas_src>
import jax
import jax.numpy as jnp
import numpy as np
from jax.experimental import pallas as pl
from jax.experimental.pallas import tpu as pltpu


_ROW_ALIGN = 64          # sublane alignment for the lane-dense (B, H*W) blocking
_COMBINED_MAX_H = 32     # combined single-matmul path for spatial maps up to 32x32


def _pool_geometry(size):
    """Window taps and valid counts for TF-like 3x3 / stride-2 pooling on one axis."""
    if size % 2 == 1:
        out = (size + 1) // 2
        starts = [2 * i - 1 for i in range(out)]   # symmetric pad of 1 (odd branch)
    else:
        out = size // 2
        starts = [2 * i for i in range(out)]       # far-side pad of 1 (even branch)
    taps = [[p for p in range(s, s + 3) if 0 <= p < size] for s in starts]
    counts = [len(t) for t in taps]
    return out, taps, counts


def _dot_01(x, p01):
    """x @ p01 with f32 accumulation, where p01 is an exact 0/1 matrix.

    The MXU truncates f32 operands to bf16 per pass.  Because p01 is exact in bf16,
    splitting an f32 `x` into bf16 hi/lo parts recovers ~f32 accuracy in two
    single-pass matmuls (instead of Precision.HIGHEST's 6 passes).  Narrower float
    inputs (bf16/f16) are fed to the MXU directly (1 pass).
    """
    if x.dtype == jnp.float32:
        hi = x.astype(jnp.bfloat16).astype(jnp.float32)
        lo = x - hi
        return (jnp.dot(hi, p01, precision=jax.lax.Precision.DEFAULT,
                        preferred_element_type=jnp.float32)
                + jnp.dot(lo, p01, precision=jax.lax.Precision.DEFAULT,
                          preferred_element_type=jnp.float32))
    return jnp.dot(x, p01, precision=jax.lax.Precision.DEFAULT,
                   preferred_element_type=jnp.float32)


def _combined_kernel(x_ref, p_ref, s_ref, o_ref):
    # x_ref: (TB, H*W) lane-dense block; p_ref: (H*W, Ho*Wo) 0/1; s_ref: (1, Ho*Wo) f32.
    sums = _dot_01(x_ref[...], p_ref[...])             # window sums, f32
    o_ref[...] = (sums * s_ref[...]).astype(o_ref.dtype)   # one wide full-block store


def _make_split_kernel(row_taps):
    def kernel(x_ref, pw_ref, inv_ref, o_ref, acc_ref):
        # x_ref: (TB, H, W); pw_ref: (W, Wo) 0/1 f32; inv_ref: (Ho, Wo) f32
        # acc_ref: (TB, Ho, Wo) f32 VMEM scratch (single cast+store at the end).
        pw = pw_ref[...]
        for i, taps in enumerate(row_taps):
            acc = x_ref[:, taps[0], :].astype(jnp.float32)    # row pooling on the VPU
            for r in taps[1:]:
                acc = acc + x_ref[:, r, :].astype(jnp.float32)
            acc_ref[:, i, :] = _dot_01(acc, pw)               # column pooling on the MXU
        o_ref[...] = (acc_ref[...] * inv_ref[...]).astype(o_ref.dtype)
    return kernel


def _pick_block_rows(B, row_bytes, *, target_bytes=8 << 20, min_bytes=1 << 20):
    """Rows per grid step: ~target_bytes of input per block (cdiv grid handles tails)."""
    rows = max(1, int(target_bytes // row_bytes))
    # Keep >= 2 grid steps (v7x dual TensorCore / pipeline overlap) unless that would
    # shrink blocks below ~min_bytes.
    half = -(-B // 2)
    if half * row_bytes >= min_bytes:
        rows = min(rows, half)
    return min(rows, B)


def _x_block_spec(block_shape, index_map, deep_buffer):
    """Input BlockSpec; asks for 3-deep buffering when there are many small blocks."""
    if deep_buffer and hasattr(pl, "Buffered"):
        try:
            return pl.BlockSpec(block_shape, index_map, pipeline_mode=pl.Buffered(3))
        except TypeError:          # pipeline_mode not available in this jax build
            pass
    return pl.BlockSpec(block_shape, index_map)


def tf_avg_pool3d(x, block_rows=None):
    """x: (N, C, T, H, W) -> (N, C, T, H_out, W_out), same dtype (tfAvgPool3D.forward)."""
    if x.shape[-1] != x.shape[-2]:
        raise RuntimeError("only same shape for h and w are supported by avg with tf_like")
    N, C, T, H, W = x.shape
    Ho, row_taps, row_counts = _pool_geometry(H)
    Wo, col_taps, col_counts = _pool_geometry(W)

    B = N * C * T
    itemsize = x.dtype.itemsize
    row_bytes = H * W * itemsize
    use_combined = H <= _COMBINED_MAX_H

    if block_rows is None:
        block_rows = _pick_block_rows(B, row_bytes)
    block_rows = max(1, min(int(block_rows), B))
    if use_combined and block_rows < B:
        # Second-to-last (sublane) dim of the lane-dense 2-D block must be tile-aligned.
        block_rows = min(B, pl.cdiv(block_rows, _ROW_ALIGN) * _ROW_ALIGN)
    num_steps = pl.cdiv(B, block_rows)           # cdiv grid; the tail block is masked
    deep_buffer = num_steps >= 4 and block_rows * row_bytes <= (2 << 20)

    if use_combined:
        # Combined 0/1 pooling matrix (row AND column window sums in one matmul) plus
        # the reciprocal valid-count vector, applied exactly on the VPU in f32.
        p_np = np.zeros((H * W, Ho * Wo), np.float32)
        s_np = np.zeros((1, Ho * Wo), np.float32)
        for i, rt in enumerate(row_taps):
            for j, ct in enumerate(col_taps):
                col = i * Wo + j
                for r in rt:
                    for c in ct:
                        p_np[r * W + c, col] = 1.0
                s_np[0, col] = 1.0 / (row_counts[i] * col_counts[j])
        weights = (jnp.asarray(p_np, dtype=x.dtype), jnp.asarray(s_np))
        weight_bytes = p_np.size * itemsize + s_np.size * 4

        x_flat = x.reshape(B, H * W)             # lane-dense I/O; reshape is free in HBM
        kernel = _combined_kernel
        in_specs = [
            _x_block_spec((block_rows, H * W), lambda b: (b, 0), deep_buffer),
            pl.BlockSpec((H * W, Ho * Wo), lambda b: (0, 0)),
            pl.BlockSpec((1, Ho * Wo), lambda b: (0, 0)),
        ]
        out_shape = jax.ShapeDtypeStruct((B, Ho * Wo), x.dtype)
        out_spec = pl.BlockSpec((block_rows, Ho * Wo), lambda b: (b, 0))
        scratch_shapes = ()
        scratch_bytes = 0
        flops = 2 * B * (H * W) * (Ho * Wo)
    else:
        # Split path for large maps (keeps v5e HBM-bound and the weights tiny).
        pw_np = np.zeros((W, Wo), np.float32)
        for j, ct in enumerate(col_taps):
            pw_np[ct, j] = 1.0
        inv_np = np.array([[1.0 / (rc * cc) for cc in col_counts] for rc in row_counts],
                          np.float32)
        weights = (jnp.asarray(pw_np), jnp.asarray(inv_np))
        weight_bytes = (pw_np.size + inv_np.size) * 4

        x_flat = x.reshape(B, H, W)
        kernel = _make_split_kernel(row_taps)
        in_specs = [
            _x_block_spec((block_rows, H, W), lambda b: (b, 0, 0), deep_buffer),
            pl.BlockSpec((W, Wo), lambda b: (0, 0)),
            pl.BlockSpec((Ho, Wo), lambda b: (0, 0)),
        ]
        out_shape = jax.ShapeDtypeStruct((B, Ho, Wo), x.dtype)
        out_spec = pl.BlockSpec((block_rows, Ho, Wo), lambda b: (b, 0, 0))
        scratch_shapes = (pltpu.VMEM((block_rows, Ho, Wo), jnp.float32),)
        scratch_bytes = block_rows * Ho * Wo * 4
        flops = 2 * B * Ho * W * Wo + 2 * B * H * W

    # Explicit scoped-VMEM budget: v5e defaults to 16 MiB; cap at 48 MiB so the same
    # tiling is safe within v7x's 64 MiB physical VMEM.
    in_bufs = 3 if deep_buffer else 2
    out_block_bytes = block_rows * Ho * Wo * itemsize
    needed = (in_bufs * block_rows * row_bytes + 2 * out_block_bytes
              + 2 * weight_bytes + scratch_bytes + (1 << 20))
    vmem_limit = int(min(48 << 20, max(32 << 20, needed)))
    bytes_accessed = B * (H * W + Ho * Wo) * itemsize + num_steps * weight_bytes

    out_flat = pl.pallas_call(
        kernel,
        out_shape=out_shape,
        grid=(num_steps,),
        in_specs=in_specs,
        out_specs=out_spec,
        scratch_shapes=scratch_shapes,
        compiler_params=pltpu.CompilerParams(
            dimension_semantics=("parallel",),
            vmem_limit_bytes=vmem_limit),
        cost_estimate=pl.CostEstimate(flops=int(flops), transcendentals=0,
                                      bytes_accessed=int(bytes_accessed)),
    )(x_flat, *weights)
    return out_flat.reshape(N, C, T, Ho, Wo)


# ----------------------------- pure-JAX reference -----------------------------

def _sum_pool_3x3_s2(xp):
    """3x3 / stride-2 window sums over the last two dims (small static loops)."""
    Hp, Wp = xp.shape[-2], xp.shape[-1]
    Ho = (Hp - 3) // 2 + 1
    Wo = (Wp - 3) // 2 + 1
    rows = []
    for i in range(Ho):
        cols = []
        for j in range(Wo):
            win = xp[..., 2 * i:2 * i + 3, 2 * j:2 * j + 3]
            cols.append(jnp.sum(win, axis=(-2, -1)))
        rows.append(jnp.stack(cols, axis=-1))
    return jnp.stack(rows, axis=-2)


def tf_avg_pool3d_reference(x):
    """Mirrors the PyTorch forward literally (both parity branches)."""
    if x.shape[-1] != x.shape[-2]:
        raise RuntimeError("only same shape for h and w are supported by avg with tf_like")
    f1 = x.shape[-1] % 2 != 0
    if f1:
        pad = ((0, 0),) * 3 + ((1, 1), (1, 1))
        s = _sum_pool_3x3_s2(jnp.pad(x, pad))
        c = _sum_pool_3x3_s2(jnp.pad(jnp.ones_like(x), pad))
        return s / c                                   # count_include_pad=False
    pad = ((0, 0),) * 3 + ((0, 1), (0, 1))
    out = _sum_pool_3x3_s2(jnp.pad(x, pad)) / 9.0
    out = out.at[..., -1].multiply(9.0 / 6.0)          # last column fix-up
    out = out.at[..., -1, :].multiply(9.0 / 6.0)       # last row fix-up
    return out


if __name__ == "__main__":
    key = jax.random.PRNGKey(0)
    cases = [
        # (shape,                 dtype,        block_rows, tol)
        ((2, 8, 3, 8, 8),        jnp.float32,  None, 1e-4),  # even H, lane-dense combined path
        ((2, 8, 3, 9, 9),        jnp.float32,  None, 1e-4),  # odd H, combined path
        ((1, 2, 2, 33, 33),      jnp.float32,  None, 1e-4),  # odd H, split (H > 32) path
        ((4, 8, 13, 16, 16),     jnp.float32,  64,   1e-4),  # cdiv grid: 7 steps + masked tail + deep buffering
        ((2, 4, 3, 8, 8),        jnp.bfloat16, None, 2e-2),  # bf16 I/O (1 MXU pass, f32 accumulation)
    ]
    for idx, (shape, dtype, br, tol) in enumerate(cases):
        x = jax.random.normal(jax.random.fold_in(key, idx), shape,
                              dtype=jnp.float32).astype(dtype)
        out = jax.block_until_ready(tf_avg_pool3d(x, block_rows=br))
        ref = jax.block_until_ready(tf_avg_pool3d_reference(x.astype(jnp.float32)))
        assert out.dtype == x.dtype and out.shape == ref.shape
        np.testing.assert_allclose(np.asarray(out.astype(jnp.float32)),
                                   np.asarray(ref), rtol=tol, atol=tol)
    print("KERNEL_OK")
</pallas_src>

<mosaic_0001>
module attributes {stable_mosaic.version = 11 : i64} {
  func.func @_combined_kernel(%arg0: i32, %arg1: memref<48x64xf32, #tpu.memory_space<vmem>>, %arg2: memref<64x16xf32, #tpu.memory_space<vmem>>, %arg3: memref<1x16xf32, #tpu.memory_space<vmem>>, %arg4: memref<48x16xf32, #tpu.memory_space<vmem>>) attributes {dimension_semantics = [#tpu.dimension_semantics<parallel>], iteration_bounds = array<i64: 1>, scalar_prefetch = 0 : i64, scratch_operands = 0 : i64, tpu.core_type = #tpu.core_type<tc>, window_params = [{transform_indices = @transform_0, window_bounds = array<i64: 48, 64>}, {pipeline_mode = #tpu.pipeline_mode<synchronous>, transform_indices = @transform_1, window_bounds = array<i64: 64, 16>}, {pipeline_mode = #tpu.pipeline_mode<synchronous>, transform_indices = @transform_2, window_bounds = array<i64: 1, 16>}, {transform_indices = @transform_3, window_bounds = array<i64: 48, 16>}]} {
    %c0 = arith.constant 0 : index
    %c0_0 = arith.constant 0 : index
    %0 = vector.load %arg1[%c0, %c0_0] : memref<48x64xf32, #tpu.memory_space<vmem>>, vector<48x64xf32>
    %c0_1 = arith.constant 0 : index
    %c0_2 = arith.constant 0 : index
    %1 = vector.load %arg2[%c0_1, %c0_2] : memref<64x16xf32, #tpu.memory_space<vmem>>, vector<64x16xf32>
    %2 = arith.truncf %0 : vector<48x64xf32> to vector<48x64xbf16>
    %3 = arith.extf %2 : vector<48x64xbf16> to vector<48x64xf32>
    %4 = arith.subf %0, %3 : vector<48x64xf32>
    %cst = arith.constant dense<0.000000e+00> : vector<48x16xf32>
    %5 = tpu.matmul %3, %1, %cst {dimension_numbers = #tpu.dot_dimension_numbers<[1], [0], [0], [1], [0, 0, 1, 1], [], []>} : vector<48x64xf32>, vector<64x16xf32>, vector<48x16xf32> -> vector<48x16xf32>
    %cst_3 = arith.constant dense<0.000000e+00> : vector<48x16xf32>
    %6 = tpu.matmul %4, %1, %cst_3 {dimension_numbers = #tpu.dot_dimension_numbers<[1], [0], [0], [1], [0, 0, 1, 1], [], []>} : vector<48x64xf32>, vector<64x16xf32>, vector<48x16xf32> -> vector<48x16xf32>
    %7 = arith.addf %5, %6 : vector<48x16xf32>
    %c0_4 = arith.constant 0 : index
    %c0_5 = arith.constant 0 : index
    %8 = vector.load %arg3[%c0_4, %c0_5] : memref<1x16xf32, #tpu.memory_space<vmem>>, vector<1x16xf32>
    %9 = vector.broadcast %8 : vector<1x16xf32> to vector<48x16xf32>
    %10 = arith.mulf %7, %9 : vector<48x16xf32>
    %c0_6 = arith.constant 0 : index
    %c0_7 = arith.constant 0 : index
    %11 = vector.load %arg4[%c0_6, %c0_7] : memref<48x16xf32, #tpu.memory_space<vmem>>, vector<48x16xf32>
    tpu.vector_store %arg4[%c0_6, %c0_7], %10 {strides = array<i32>} : memref<48x16xf32, #tpu.memory_space<vmem>>, vector<48x16xf32>,
    return
  }
  func.func @transform_0(%arg0: i32) -> (i32, i32) {
    %c0_i32 = arith.constant 0 : i32
    %c0_i32_0 = arith.constant 0 : i32
    return %arg0, %c0_i32 : i32, i32
  }
  func.func @transform_1(%arg0: i32) -> (i32, i32) {
    %c0_i32 = arith.constant 0 : i32
    %c0_i32_0 = arith.constant 0 : i32
    %c0_i32_1 = arith.constant 0 : i32
    return %c0_i32, %c0_i32_0 : i32, i32
  }
  func.func @transform_2(%arg0: i32) -> (i32, i32) {
    %c0_i32 = arith.constant 0 : i32
    %c0_i32_0 = arith.constant 0 : i32
    %c0_i32_1 = arith.constant 0 : i32
    return %c0_i32, %c0_i32_0 : i32, i32
  }
  func.func @transform_3(%arg0: i32) -> (i32, i32) {
    %c0_i32 = arith.constant 0 : i32
    %c0_i32_0 = arith.constant 0 : i32
    return %arg0, %c0_i32 : i32, i32
  }
}

</mosaic_0001>

<bundles_post_ra>
// kernel: tpu_custom_call.1
= control target key start
LH: loop header
LB: loop body
LE: loop exit
PB: predicated region body
PF: predicated region fallthrough
CT: control target
= control target key end

     0   :  { %vm43_vm0 = vcmask 523264   ;;  %vm283_vm1 = vcmask 130048   ;;  %s524_s1 = inlined_call_operand.vmem [shape: f32[64,16], index: 1, kind: input, shape index: {}]   ;;  %s525_s0 = inlined_call_operand.vmem [shape: f32[48,64], index: 0, kind: input, shape index: {}]   ;;  %s526_s2 = inlined_call_operand.vmem [shape: f32[1,16], index: 2, kind: input, shape index: {}]   ;;  %s527_s3 = inlined_call_operand.vmem [shape: f32[48,16], index: 3, kind: output, shape index: {}]  }
   0x1   :  { %v20_v0 = vld [vmem:[%s524_s1] sm:$0xff]  ;;  %v21_v1 = vld [vmem:[%s524_s1 + $0x8] sm:$0xff]  ;;  %v22_v2 = vld [vmem:[%s524_s1 + $0x10] sm:$0xff] }
   0x2   :  { %v385_v3 = vpack.c.bf16 %v21_v1, %v20_v0  ;;  %v23_v4 = vld [vmem:[%s524_s1 + $0x18] sm:$0xff]  ;;  %v24_v6 = vld [vmem:[%s524_s1 + $0x20] sm:$0xff]  ;;  %v25_v7 = vld [vmem:[%s524_s1 + $0x28] sm:$0xff] }
   0x3   :  { %v389_v5 = vpack.c.bf16 %v23_v4, %v22_v2  ;;  %v14_v8 = vld [vmem:[%s525_s0] sm:$0xff]  ;;  %v15_v9 = vld [vmem:[%s525_s0 + $0x8] sm:$0xff]  ;;  %v393_v11 = vpack.c.bf16 %v25_v7, %v24_v6  ;;  %v16_v12 = vld [vmem:[%s525_s0 + $0x10] sm:$0xff] }
   0x4   :  { %386 = vmatprep.subr.bf16.mxu1 %v385_v3  ;;  %402 = vmatprep.subr.bf16.mxu0 %v385_v3  ;;  %v28_v10 = vpack.c.bf16 %v15_v9, %v14_v8  ;;  %v17_v13 = vld [vmem:[%s525_s0 + $0x18] sm:$0xff]  ;;  %v26_v14 = vld [vmem:[%s524_s1 + $0x30] sm:$0xff]  ;;  %v18_v20 = vld [vmem:[%s525_s0 + $0x20] sm:$0xff] }
   0x5   :  { %388 = vmatpush3.bf16.msra.mxu1 %v385_v3  ;;  %404 = vmatpush3.bf16.msra.mxu0 %v385_v3  ;;  %v27_v15 = vld [vmem:[%s524_s1 + $0x38] sm:$0xff]  ;;  %v29_v18 = vpack.c.bf16 %v17_v13, %v16_v12  ;;  %v19_v21 = vld [vmem:[%s525_s0 + $0x28] sm:$0xff]  ;;  %v306_v35 = vld [vmem:[%s526_s2] ss:$0 sm:$0xff] }
   0x6   :  { %390 = vmatprep.subr.bf16.mxu1 %v389_v5  ;;  %406 = vmatprep.subr.bf16.mxu0 %v389_v5  ;;  %v31_v16 = vunpack.c.l.bf16 %v28_v10  ;;  %v397_v19 = vpack.c.bf16 %v27_v15, %v26_v14  ;;  %v32_v22 = vunpack.c.h.bf16 %v28_v10  ;;  %v30_v24 = vpack.c.bf16 %v19_v21, %v18_v20 }
   0x7   :  { %v33_v23 = vunpack.c.l.bf16 %v29_v18  ;;  %v34_v26 = vunpack.c.h.bf16 %v29_v18 }
   0x8   :  { %v37_v17 = vsub.f32 %v14_v8, %v31_v16  ;;  %376 = vmatprep.mubr.msk.f32.mxu0 %vm43_vm0, %v31_v16  ;;  %v38_v25 = vsub.f32 %v15_v9, %v32_v22  ;;  %v35_v28 = vunpack.c.l.bf16 %v30_v24  ;;  %v36_v30 = vunpack.c.h.bf16 %v30_v24 }
   0x9   :  { %392 = vmatpush3.bf16.msra.mxu1 %v389_v5  ;;  %408 = vmatpush3.bf16.msra.mxu0 %v389_v5  ;;  %v39_v27 = vsub.f32 %v16_v12, %v33_v23  ;;  %v40_v29 = vsub.f32 %v17_v13, %v34_v26 }
   0xa   :  { %394 = vmatprep.subr.bf16.mxu1 %v393_v11  ;;  %410 = vmatprep.subr.bf16.mxu0 %v393_v11  ;;  %v41_v31 = vsub.f32 %v18_v20, %v35_v28  ;;  %v42_v32 = vsub.f32 %v19_v21, %v36_v30 }
   0xb   :  { %351 = vmatprep.mubr.msk.f32.mxu1 %vm43_vm0, %v37_v17 }
   0xd   :  { %396 = vmatpush3.bf16.msra.mxu1 %v393_v11  ;;  %412 = vmatpush3.bf16.msra.mxu0 %v393_v11 }
   0xe   :  { %398 = vmatprep.subr.bf16.mxu1 %v397_v19  ;;  %414 = vmatprep.subr.bf16.mxu0 %v397_v19 }
  0x11   :  { %400 = vmatpush3.bf16.msra.mxu1 %v397_v19  ;;  %416 = vmatpush3.bf16.msra.mxu0 %v397_v19 }
  0x14   :  { %352 = vmatmul.mubr.msk.f32.vlgmr.msra.gmra.mrb[0].mxu1 %vm43_vm0, %v38_v25  ;;  %377 = vmatmul.mubr.msk.f32.vlgmr.msra.gmra.mrb[0].mxu0 %vm43_vm0, %v32_v22 }
  0x15   :  { %354 = vmatprep.mubr.msk.f32.mxu1 %vm43_vm0, %v39_v27  ;;  %379 = vmatprep.mubr.msk.f32.mxu0 %vm43_vm0, %v33_v23 }
  0x18   :  { %355 = vmatmul.mubr.msk.f32.gmra.mrb[2].mxu1 %vm43_vm0, %v40_v29  ;;  %380 = vmatmul.mubr.msk.f32.gmra.mrb[2].mxu0 %vm43_vm0, %v34_v26 }
  0x19   :  { %357 = vmatprep.mubr.msk.f32.mxu1 %vm43_vm0, %v41_v31  ;;  %382 = vmatprep.mubr.msk.f32.mxu0 %vm43_vm0, %v35_v28 }
  0x1c   :  { %358 = vmatmul.mubr.msk.f32.gmra.mrb[4].mxu1 %vm43_vm0, %v42_v32  ;;  %383 = vmatmul.mubr.msk.f32.gmra.mrb[4].mxu0 %vm43_vm0, %v36_v30 }
  0xe7   :  { %v353_v33 = vpop.f32.mrb[0].mxu1  ;;  %v378_v34 = vpop.f32.mrb[0].mxu0 }
  0xe8   :  { %v247_v36 = vadd.f32 %v378_v34, %v353_v33  ;;  %v128_v37 = vpop.f32.mrb[1].mxu1  ;;  %v241_v38 = vpop.f32.mrb[1].mxu0 }
  0xe9   :  { %v242_v39 = vadd.f32 %v241_v38, %v128_v37 }
  0xea   :  { %v278_v40 = vmul.f32 %v306_v35, %v247_v36 }
  0xeb   :  { %v277_v41 = vmul.f32 %v306_v35, %v242_v39  ;;  %v356_v42 = vpop.f32.mrb[2].mxu1  ;;  %v381_v43 = vpop.f32.mrb[2].mxu0 }
  0xec   :  { %285 = vst.msk [vmem:[%s527_s3 + $0x8] sm:$0xff] %vm283_vm1, %v278_v40  ;;  %v257_v44 = vadd.f32 %v381_v43, %v356_v42  ;;  %v138_v45 = vpop.f32.mrb[3].mxu1  ;;  %v251_v46 = vpop.f32.mrb[3].mxu0 }
  0xed   :  { %284 = vst.msk [vmem:[%s527_s3] sm:$0xff] %vm283_vm1, %v277_v41  ;;  %v252_v47 = vadd.f32 %v251_v46, %v138_v45 }
  0xee   :  { %v280_v48 = vmul.f32 %v306_v35, %v257_v44 }
  0xef   :  { %v279_v49 = vmul.f32 %v306_v35, %v252_v47  ;;  %v359_v50 = vpop.f32.mrb[4].mxu1  ;;  %v384_v51 = vpop.f32.mrb[4].mxu0 }
  0xf0   :  { %287 = vst.msk [vmem:[%s527_s3 + $0x18] sm:$0xff] %vm283_vm1, %v280_v48  ;;  %v267_v52 = vadd.f32 %v384_v51, %v359_v50  ;;  %v148_v53 = vpop.f32.mrb[5].mxu1  ;;  %v261_v54 = vpop.f32.mrb[5].mxu0 }
  0xf1   :  { %286 = vst.msk [vmem:[%s527_s3 + $0x10] sm:$0xff] %vm283_vm1, %v279_v49  ;;  %v262_v55 = vadd.f32 %v261_v54, %v148_v53 }
  0xf2   :  { %v282_v56 = vmul.f32 %v306_v35, %v267_v52 }
  0xf3   :  { %v281_v57 = vmul.f32 %v306_v35, %v262_v55 }
  0xf4   :  { %289 = vst.msk [vmem:[%s527_s3 + $0x28] sm:$0xff] %vm283_vm1, %v282_v56 }
  0xf5   :  { %288 = vst.msk [vmem:[%s527_s3 + $0x20] sm:$0xff] %vm283_vm1, %v281_v57 }

</bundles_post_ra>
